<compile_context>
chip_gen: v5e
topology: v5e:2x2
jax: 0.10.0
libtpu: 0.0.40
codegen_flags: <defaults>
</compile_context>

<pallas_src>
import numpy as np
import jax
import jax.numpy as jnp
from jax.experimental import pallas as pl
from jax.experimental.pallas import tpu as pltpu

HIDDEN = 2          # hidden_size (see note above)
DEC_IN = 32         # decoder_input_dim
DEC_H = 4           # decoder GRU hidden size
N_CLASSES = 80
SCORE_DIM, BOX_DIM, ORIGIN_DIM = 80, 4, 12   # concat dims sum to 96 (Linear(hidden+96, hidden))


def _vmem():
    return pl.BlockSpec(memory_space=pltpu.MemorySpace.VMEM)


# --------------- kernel A: fused appear_linear + concat + feature_linear ---------------

def _feature_kernel(f_ref, s_ref, bx_ref, os_ref, aw_ref, ab_ref,
                    fwh_ref, fws_ref, fwb_ref, fwo_ref, fb_ref, out_ref):
    # relu(feats @ appear_w + b); then feature_linear applied as 4 partial dots so the
    # (N, hidden+96) concat is never built.
    h1 = jnp.maximum(
        jnp.dot(f_ref[...], aw_ref[...], preferred_element_type=jnp.float32) + ab_ref[...],
        0.0)
    y = (jnp.dot(h1, fwh_ref[...], preferred_element_type=jnp.float32)
         + jnp.dot(s_ref[...], fws_ref[...], preferred_element_type=jnp.float32)
         + jnp.dot(bx_ref[...], fwb_ref[...], preferred_element_type=jnp.float32)
         + jnp.dot(os_ref[...], fwo_ref[...], preferred_element_type=jnp.float32)
         + fb_ref[...])
    out_ref[...] = jnp.maximum(y, 0.0)


def feature_projection(feats, scores, boxes, origin_scores, aw, ab, fwh, fws, fwb, fwo, fb):
    n = feats.shape[0]
    return pl.pallas_call(
        _feature_kernel,
        out_shape=jax.ShapeDtypeStruct((n, HIDDEN), jnp.float32),
        in_specs=[_vmem()] * 11,
        out_specs=_vmem(),
    )(feats, scores, boxes, origin_scores, aw, ab, fwh, fws, fwb, fwo, fb)


# ------- kernel B: fused per-class bidirectional encoder GRU + decoder GRU + out -------

def _make_class_kernel(maxl1):
    H = HIDDEN
    D = DEC_H

    def vpu_mm(x, w, b):
        # (T, K) @ (K, M) + (1, M) as a broadcast-fma chain (K tiny) — keeps the MXU
        # out of the recurrence / small projections.
        acc = b
        for k in range(w.shape[0]):
            acc = acc + x[:, k:k + 1] * w[k:k + 1, :]
        return acc

    def gru_step(gx, h, wh, bh, hd):
        # gx = x@Wi + bi, precomputed outside the loop.  Gate order [r|z|n] (PyTorch).
        gh = bh
        for k in range(hd):                      # VPU fma chain for h @ Wh
            gh = gh + h[:, k:k + 1] * wh[k:k + 1, :]
        rz = jax.nn.sigmoid(gx[:, :2 * hd] + gh[:, :2 * hd])   # r and z in one activation
        r, z = rz[:, :hd], rz[:, hd:]
        n = jnp.tanh(gx[:, 2 * hd:] + r * gh[:, 2 * hd:])
        return (1.0 - z) * n + z * h

    def kern(lens_ref, cids_ref,
             enc_x_ref, enc_xr_ref, dec_x_ref,
             ewi_f_ref, ewi_b_ref, ewh_f_ref, ewh_b_ref,
             ebi_f_ref, ebi_b_ref, ebh_f_ref, ebh_b_ref,
             dwi_ref, dwh_ref, dbi_ref, dbh_ref,
             ow_ref, ob_ref, o_ref):
        i = pl.program_id(0)
        T = lens_ref[i] + 1                      # segment length + EOS/SOS token

        enc_x = enc_x_ref[0]                     # (maxl1, H)  forward order, EOS appended
        enc_xr = enc_xr_ref[0]                   # (maxl1, H)  reversed order (EOS first)

        # Hoisted input projections for all T rows at once.
        xp_f = vpu_mm(enc_x, ewi_f_ref[0], ebi_f_ref[0])    # (maxl1, 3H)
        xp_b = vpu_mm(enc_xr, ewi_b_ref[0], ebi_b_ref[0])

        ewh_f, ebh_f = ewh_f_ref[0], ebh_f_ref[0]
        ewh_b, ebh_b = ewh_b_ref[0], ebh_b_ref[0]

        h_fw = jnp.zeros((1, H), jnp.float32)    # initHidden -> zeros per direction
        h_bw = jnp.zeros((1, H), jnp.float32)
        for t in range(maxl1):                   # unrolled; fw/bw interleave hides latency
            valid = t < T
            h_fw = jnp.where(valid, gru_step(xp_f[t:t + 1, :], h_fw, ewh_f, ebh_f, H), h_fw)
            h_bw = jnp.where(valid, gru_step(xp_b[t:t + 1, :], h_bw, ewh_b, ebh_b, H), h_bw)

        # TODO(synk): the original hands the (2,1,hidden) bidirectional encoder hidden
        # directly to a GRU(32,4) decoder, which is shape-invalid in PyTorch; we flatten
        # both directions into the decoder's (1, 4) initial hidden.
        h = jnp.concatenate([h_fw, h_bw], axis=1)            # (1, DEC_H)

        # Decoder (teacher-forcing path).  Input projection hoisted as one matmul.
        dec_x = dec_x_ref[0]                                  # (maxl1, DEC_IN): [SOS, emb(labels)]
        xp_d = jnp.dot(dec_x, dwi_ref[0],
                       preferred_element_type=jnp.float32) + dbi_ref[0]   # (maxl1, 3*DEC_H)
        dwh, dbh = dwh_ref[0], dbh_ref[0]

        hs = []
        for t in range(maxl1):
            h = gru_step(xp_d[t:t + 1, :], h, dwh, dbh, D)
            hs.append(h)                                      # rows beyond T are discarded host-side
        dec_out = jnp.concatenate(hs, axis=0)                 # (maxl1, DEC_H)

        # Fused self.out + log_softmax over all rows, single lane-dense store.
        logits = vpu_mm(dec_out, ow_ref[...], ob_ref[...])    # (maxl1, 4)
        m = jnp.max(logits, axis=-1, keepdims=True)
        s = logits - m
        o_ref[...] = (s - jnp.log(jnp.sum(jnp.exp(s), axis=-1, keepdims=True)))[None, :, :]

    return kern


def fused_class_forward(lens, cids, enc_seg, enc_seg_rev, dec_seg,
                        ewi_f, ewi_b, ewh_f, ewh_b, ebi_f, ebi_b, ebh_f, ebh_b,
                        dwi, dwh, dbi, dbh, out_w, out_b):
    a = enc_seg.shape[0]
    maxl1 = enc_seg.shape[1]

    def seg_spec(d):
        return pl.BlockSpec((1, maxl1, d), lambda i, ln, ci: (i, 0, 0))

    def cls_spec(trailing):
        zeros = (0,) * len(trailing)
        return pl.BlockSpec((1,) + trailing,
                            lambda i, ln, ci, _z=zeros: (ci[i],) + _z)

    grid_spec = pltpu.PrefetchScalarGridSpec(
        num_scalar_prefetch=2,
        grid=(a,),
        in_specs=[
            seg_spec(HIDDEN), seg_spec(HIDDEN), seg_spec(DEC_IN),
            cls_spec((HIDDEN, 3 * HIDDEN)), cls_spec((HIDDEN, 3 * HIDDEN)),   # enc wi fw/bw
            cls_spec((HIDDEN, 3 * HIDDEN)), cls_spec((HIDDEN, 3 * HIDDEN)),   # enc wh fw/bw
            cls_spec((1, 3 * HIDDEN)), cls_spec((1, 3 * HIDDEN)),             # enc bi fw/bw
            cls_spec((1, 3 * HIDDEN)), cls_spec((1, 3 * HIDDEN)),             # enc bh fw/bw
            cls_spec((DEC_IN, 3 * DEC_H)), cls_spec((DEC_H, 3 * DEC_H)),      # dec wi, wh
            cls_spec((1, 3 * DEC_H)), cls_spec((1, 3 * DEC_H)),               # dec bi, bh
            pl.BlockSpec((DEC_H, 4), lambda i, ln, ci: (0, 0)),               # out_w (shared)
            pl.BlockSpec((1, 4), lambda i, ln, ci: (0, 0)),                   # out_b (shared)
        ],
        out_specs=pl.BlockSpec((1, maxl1, 4), lambda i, ln, ci: (i, 0, 0)),
    )
    return pl.pallas_call(
        _make_class_kernel(maxl1),
        out_shape=jax.ShapeDtypeStruct((a, maxl1, 4), jnp.float32),
        grid_spec=grid_spec,
        compiler_params=pltpu.CompilerParams(dimension_semantics=("parallel",)),
    )(lens, cids, enc_seg, enc_seg_rev, dec_seg,
      ewi_f, ewi_b, ewh_f, ewh_b, ebi_f, ebi_b, ebh_f, ebh_b,
      dwi, dwh, dbi, dbh, out_w, out_b)


# --------------------------- parameters (synthetic) ---------------------------

def init_params(key):
    keys = jax.random.split(key, 15)

    def rnd(k, shape, scale=0.1):
        return scale * jax.random.normal(k, shape, dtype=jnp.float32)

    # Gate-concatenated GRU weights: last axis is [r | z | n] (PyTorch gate order);
    # wi is (Din, 3H) / wh is (H, 3H) i.e. PyTorch weight_ih/_hh transposed.
    return dict(
        appear_w=rnd(keys[0], (1024, HIDDEN)),                     # encoder_appear_linear
        appear_b=rnd(keys[1], (1, HIDDEN)),
        feat_w=rnd(keys[2], (HIDDEN + 96, HIDDEN)),                # encoder_feature_linear
        feat_b=rnd(keys[3], (1, HIDDEN)),
        enc_wi=rnd(keys[4], (N_CLASSES, 2, HIDDEN, 3 * HIDDEN)),   # [class, dir, in, 3H]
        enc_wh=rnd(keys[5], (N_CLASSES, 2, HIDDEN, 3 * HIDDEN)),
        enc_bi=rnd(keys[6], (N_CLASSES, 2, 1, 3 * HIDDEN)),
        enc_bh=rnd(keys[7], (N_CLASSES, 2, 1, 3 * HIDDEN)),
        dec_wi=rnd(keys[8], (N_CLASSES, DEC_IN, 3 * DEC_H)),       # GRU(32, 4) per class
        dec_wh=rnd(keys[9], (N_CLASSES, DEC_H, 3 * DEC_H)),
        dec_bi=rnd(keys[10], (N_CLASSES, 1, 3 * DEC_H)),
        dec_bh=rnd(keys[11], (N_CLASSES, 1, 3 * DEC_H)),
        out_w=rnd(keys[12], (2 * HIDDEN, 4)),                      # self.out
        out_b=rnd(keys[13], (1, 4)),
        emb=rnd(keys[14], (4, DEC_IN)),                            # decoder_embedding
    )


# ------------------------------- forward pass -------------------------------

def _pad_rows(a, n):
    return jnp.pad(a, ((0, n - a.shape[0]), (0, 0)))


def encoder_decoder_forward(params, feats, boxes, scores, origin_scores, labels, weights,
                            unique_class, unique_class_len):
    # unique_class / unique_class_len are host numpy arrays: the torch code drives the
    # per-class loop with python int() of them, so segment layout is static here as well.
    H = HIDDEN

    # relu(appear_linear(x)); concat(score, box, origin_score); relu(feature_linear(.))
    fw = params['feat_w']
    enc_in = feature_projection(
        feats, scores, boxes, origin_scores,
        params['appear_w'], params['appear_b'],
        fw[:H], fw[H:H + SCORE_DIM],
        fw[H + SCORE_DIM:H + SCORE_DIM + BOX_DIM],
        fw[H + SCORE_DIM + BOX_DIM:], params['feat_b'])                     # (N, HIDDEN)

    # active classes (host-driven, as in the torch code's int() loop)
    active = []
    for j in range(N_CLASSES):
        if int(unique_class[j]) == 0:
            continue
        s = int(unique_class_len[j])
        e = int(unique_class_len[j + 1])
        active.append((j, s, e))
    maxl1 = max(e - s for _, s, e in active) + 1                            # max segment + EOS/SOS

    enc_eos = jnp.ones((1, H), jnp.float32)            # encoder_EOS = ones(1, 1, hidden)
    dec_emb_all = params['emb'][labels]                # decoder_embedding(all_class_box_label)
    sos = params['emb'][2][None, :]                    # decoder_SOS (token id 2)

    enc_segs, enc_segs_rev, dec_segs, lens, cids = [], [], [], [], []
    lbls, wts = [], []
    for j, s, e in active:
        seq = jnp.concatenate([enc_in[s:e], enc_eos], axis=0)               # (L+1, HIDDEN)
        dseq = jnp.concatenate([sos, dec_emb_all[s:e]], axis=0)             # (L+1, DEC_IN)
        enc_segs.append(_pad_rows(seq, maxl1))
        enc_segs_rev.append(_pad_rows(seq[::-1], maxl1))
        dec_segs.append(_pad_rows(dseq, maxl1))
        lens.append(e - s)
        cids.append(j)
        # TODO(synk): the original label/weight bookkeeping line is truncated in the source
        # ("torch.cat(all_class_box_"); we append class labels/weights plus an EOS entry so
        # they align with the L+1 decoder outputs.
        lbls.append(jnp.concatenate([labels[s:e], jnp.array([3], labels.dtype)]))
        wts.append(jnp.concatenate([weights[s:e], jnp.array([1.0], weights.dtype)]))

    enc_seg = jnp.stack(enc_segs)                      # (A, maxl1, HIDDEN)
    enc_seg_rev = jnp.stack(enc_segs_rev)
    dec_seg = jnp.stack(dec_segs)                      # (A, maxl1, DEC_IN)
    lens_arr = jnp.array(lens, dtype=jnp.int32)
    cids_arr = jnp.array(cids, dtype=jnp.int32)

    # TODO(synk): original flips random.random() < 0.5 between teacher forcing and greedy
    # decoding with a data-dependent early break; only the teacher-forcing path is implemented.
    out_pad = fused_class_forward(
        lens_arr, cids_arr, enc_seg, enc_seg_rev, dec_seg,
        params['enc_wi'][:, 0], params['enc_wi'][:, 1],
        params['enc_wh'][:, 0], params['enc_wh'][:, 1],
        params['enc_bi'][:, 0], params['enc_bi'][:, 1],
        params['enc_bh'][:, 0], params['enc_bh'][:, 1],
        params['dec_wi'], params['dec_wh'], params['dec_bi'], params['dec_bh'],
        params['out_w'], params['out_b'])              # (A, maxl1, 4) log-probs, padded

    outs = [out_pad[idx, :e - s + 1] for idx, (j, s, e) in enumerate(active)]
    output = jnp.concatenate(outs, axis=0)             # (M, 4)
    label = jnp.concatenate(lbls)
    weight = jnp.concatenate(wts)
    return output, label, weight


# ----------------------------------- main -----------------------------------

if __name__ == "__main__":
    key = jax.random.PRNGKey(0)
    pkey, dkey = jax.random.split(key)
    params = init_params(pkey)

    N = 12  # total boxes across all classes
    ks = jax.random.split(dkey, 6)
    feats = jax.random.normal(ks[0], (N, 1024), jnp.float32)
    scores = jax.random.uniform(ks[1], (N, SCORE_DIM), dtype=jnp.float32)
    boxes = jax.random.uniform(ks[2], (N, BOX_DIM), dtype=jnp.float32)
    origin_scores = jax.random.uniform(ks[3], (N, ORIGIN_DIM), dtype=jnp.float32)
    labels = jax.random.randint(ks[4], (N,), 0, 4)
    weights = jax.random.uniform(ks[5], (N,), dtype=jnp.float32)

    # host-side class bookkeeping (matches the int()-driven python loop in the torch code)
    unique_class = np.zeros((N_CLASSES,), np.int32)
    counts = np.zeros((N_CLASSES,), np.int32)
    for cls, n_boxes in [(5, 5), (17, 3), (42, 4)]:   # 5 + 3 + 4 = 12 boxes
        unique_class[cls] = 1
        counts[cls] = n_boxes
    unique_class_len = np.concatenate([[0], np.cumsum(counts)]).astype(np.int32)  # (81,)

    out, label, weight = encoder_decoder_forward(
        params, feats, boxes, scores, origin_scores, labels, weights,
        unique_class, unique_class_len)
    jax.block_until_ready((out, label, weight))
    print("KERNEL_OK")
</pallas_src>

<mosaic_0001>
module attributes {stable_mosaic.version = 11 : i64} {
  func.func @_feature_kernel(%arg0: memref<12x1024xf32, #tpu.memory_space<vmem>>, %arg1: memref<12x80xf32, #tpu.memory_space<vmem>>, %arg2: memref<12x4xf32, #tpu.memory_space<vmem>>, %arg3: memref<12x12xf32, #tpu.memory_space<vmem>>, %arg4: memref<1024x2xf32, #tpu.memory_space<vmem>>, %arg5: memref<1x2xf32, #tpu.memory_space<vmem>>, %arg6: memref<2x2xf32, #tpu.memory_space<vmem>>, %arg7: memref<80x2xf32, #tpu.memory_space<vmem>>, %arg8: memref<4x2xf32, #tpu.memory_space<vmem>>, %arg9: memref<12x2xf32, #tpu.memory_space<vmem>>, %arg10: memref<1x2xf32, #tpu.memory_space<vmem>>, %arg11: memref<12x2xf32, #tpu.memory_space<vmem>>) attributes {dimension_semantics = [], scalar_prefetch = 0 : i64, scratch_operands = 0 : i64, tpu.core_type = #tpu.core_type<tc>} {
    %c0 = arith.constant 0 : index
    %c0_0 = arith.constant 0 : index
    %0 = vector.load %arg0[%c0, %c0_0] : memref<12x1024xf32, #tpu.memory_space<vmem>>, vector<12x1024xf32>
    %c0_1 = arith.constant 0 : index
    %c0_2 = arith.constant 0 : index
    %1 = vector.load %arg4[%c0_1, %c0_2] : memref<1024x2xf32, #tpu.memory_space<vmem>>, vector<1024x2xf32>
    %cst = arith.constant dense<0.000000e+00> : vector<12x2xf32>
    %2 = tpu.matmul %0, %1, %cst {dimension_numbers = #tpu.dot_dimension_numbers<[1], [0], [0], [1], [0, 0, 1, 1], [], []>} : vector<12x1024xf32>, vector<1024x2xf32>, vector<12x2xf32> -> vector<12x2xf32>
    %c0_3 = arith.constant 0 : index
    %c0_4 = arith.constant 0 : index
    %3 = vector.load %arg5[%c0_3, %c0_4] : memref<1x2xf32, #tpu.memory_space<vmem>>, vector<1x2xf32>
    %4 = vector.broadcast %3 : vector<1x2xf32> to vector<12x2xf32>
    %5 = arith.addf %2, %4 : vector<12x2xf32>
    %cst_5 = arith.constant 0.000000e+00 : f32
    %6 = vector.broadcast %cst_5 : f32 to vector<12x2xf32>
    %7 = arith.maximumf %5, %6 : vector<12x2xf32>
    %c0_6 = arith.constant 0 : index
    %c0_7 = arith.constant 0 : index
    %8 = vector.load %arg6[%c0_6, %c0_7] : memref<2x2xf32, #tpu.memory_space<vmem>>, vector<2x2xf32>
    %cst_8 = arith.constant dense<0.000000e+00> : vector<12x2xf32>
    %9 = tpu.matmul %7, %8, %cst_8 {dimension_numbers = #tpu.dot_dimension_numbers<[1], [0], [0], [1], [0, 0, 1, 1], [], []>} : vector<12x2xf32>, vector<2x2xf32>, vector<12x2xf32> -> vector<12x2xf32>
    %c0_9 = arith.constant 0 : index
    %c0_10 = arith.constant 0 : index
    %10 = vector.load %arg1[%c0_9, %c0_10] : memref<12x80xf32, #tpu.memory_space<vmem>>, vector<12x80xf32>
    %c0_11 = arith.constant 0 : index
    %c0_12 = arith.constant 0 : index
    %11 = vector.load %arg7[%c0_11, %c0_12] : memref<80x2xf32, #tpu.memory_space<vmem>>, vector<80x2xf32>
    %cst_13 = arith.constant dense<0.000000e+00> : vector<12x2xf32>
    %12 = tpu.matmul %10, %11, %cst_13 {dimension_numbers = #tpu.dot_dimension_numbers<[1], [0], [0], [1], [0, 0, 1, 1], [], []>} : vector<12x80xf32>, vector<80x2xf32>, vector<12x2xf32> -> vector<12x2xf32>
    %13 = arith.addf %9, %12 : vector<12x2xf32>
    %c0_14 = arith.constant 0 : index
    %c0_15 = arith.constant 0 : index
    %14 = vector.load %arg2[%c0_14, %c0_15] : memref<12x4xf32, #tpu.memory_space<vmem>>, vector<12x4xf32>
    %c0_16 = arith.constant 0 : index
    %c0_17 = arith.constant 0 : index
    %15 = vector.load %arg8[%c0_16, %c0_17] : memref<4x2xf32, #tpu.memory_space<vmem>>, vector<4x2xf32>
    %cst_18 = arith.constant dense<0.000000e+00> : vector<12x2xf32>
    %16 = tpu.matmul %14, %15, %cst_18 {dimension_numbers = #tpu.dot_dimension_numbers<[1], [0], [0], [1], [0, 0, 1, 1], [], []>} : vector<12x4xf32>, vector<4x2xf32>, vector<12x2xf32> -> vector<12x2xf32>
    %17 = arith.addf %13, %16 : vector<12x2xf32>
    %c0_19 = arith.constant 0 : index
    %c0_20 = arith.constant 0 : index
    %18 = vector.load %arg3[%c0_19, %c0_20] : memref<12x12xf32, #tpu.memory_space<vmem>>, vector<12x12xf32>
    %c0_21 = arith.constant 0 : index
    %c0_22 = arith.constant 0 : index
    %19 = vector.load %arg9[%c0_21, %c0_22] : memref<12x2xf32, #tpu.memory_space<vmem>>, vector<12x2xf32>
    %cst_23 = arith.constant dense<0.000000e+00> : vector<12x2xf32>
    %20 = tpu.matmul %18, %19, %cst_23 {dimension_numbers = #tpu.dot_dimension_numbers<[1], [0], [0], [1], [0, 0, 1, 1], [], []>} : vector<12x12xf32>, vector<12x2xf32>, vector<12x2xf32> -> vector<12x2xf32>
    %21 = arith.addf %17, %20 : vector<12x2xf32>
    %c0_24 = arith.constant 0 : index
    %c0_25 = arith.constant 0 : index
    %22 = vector.load %arg10[%c0_24, %c0_25] : memref<1x2xf32, #tpu.memory_space<vmem>>, vector<1x2xf32>
    %23 = vector.broadcast %22 : vector<1x2xf32> to vector<12x2xf32>
    %24 = arith.addf %21, %23 : vector<12x2xf32>
    %cst_26 = arith.constant 0.000000e+00 : f32
    %25 = vector.broadcast %cst_26 : f32 to vector<12x2xf32>
    %26 = arith.maximumf %24, %25 : vector<12x2xf32>
    %c0_27 = arith.constant 0 : index
    %c0_28 = arith.constant 0 : index
    %27 = vector.load %arg11[%c0_27, %c0_28] : memref<12x2xf32, #tpu.memory_space<vmem>>, vector<12x2xf32>
    tpu.vector_store %arg11[%c0_27, %c0_28], %26 {strides = array<i32>} : memref<12x2xf32, #tpu.memory_space<vmem>>, vector<12x2xf32>,
    return
  }
}

</mosaic_0001>

<bundles_post_ra>
// kernel: tpu_custom_call.1
= control target key start
LH: loop header
LB: loop body
LE: loop exit
PB: predicated region body
PF: predicated region fallthrough
CT: control target
= control target key end

     0   :  { %vm459_vm0 = vcmask 1043456   ;;  %vm422_vm1 = vcmask 1041408   ;;  %vm452_vm2 = vcmask 31744   ;;  %vm492_vm3 = vcmask 97280   ;;  %s1124_s4 = inlined_call_operand.vmem [shape: f32[1024,2], index: 4, kind: input, shape index: {}]   ;;  %s1125_s0 = inlined_call_operand.vmem [shape: f32[12,1024], index: 0, kind: input, shape index: {}]   ;;  %s1126_s5 = inlined_call_operand.vmem [shape: f32[1,2], index: 5, kind: input, shape index: {}]   ;;  %s1127_s8 = inlined_call_operand.vmem [shape: f32[4,2], index: 8, kind: input, shape index: {}]   ;;  %s1128_s7 = inlined_call_operand.vmem [shape: f32[80,2], index: 7, kind: input, shape index: {}]   ;;  %s1129_s9 = inlined_call_operand.vmem [shape: f32[12,2], index: 9, kind: input, shape index: {}]   ;;  %s1130_s6 = inlined_call_operand.vmem [shape: f32[2,2], index: 6, kind: input, shape index: {}]   ;;  %s1131_s2 = inlined_call_operand.vmem [shape: f32[12,4], index: 2, kind: input, shape index: {}]   ;;  %s1132_s3 = inlined_call_operand.vmem [shape: f32[12,12], index: 3, kind: input, shape index: {}]   ;;  %s1133_s1 = inlined_call_operand.vmem [shape: f32[12,80], index: 1, kind: input, shape index: {}]   ;;  %s1134_s10 = inlined_call_operand.vmem [shape: f32[1,2], index: 10, kind: input, shape index: {}]   ;;  %s1135_s11 = inlined_call_operand.vmem [shape: f32[12,2], index: 11, kind: output, shape index: {}]  }
   0x1   :  { %v69_v0 = vld [vmem:[%s1124_s4 + $0x78] sm:$0xff]  ;;  %v68_v2 = vld [vmem:[%s1124_s4 + $0x70] sm:$0xff]  ;;  %v67_v6 = vld [vmem:[%s1124_s4 + $0x68] sm:$0xff]  ;;  %vm385_vm4 = vcmask 654336   ;;  %vm415_vm5 = vcmask 15360   ;;  %vm536_vm6 = vcmask 11264  }
   0x2   :  { %v101_v1 = vld [vmem:[%s1124_s4 + $0x178] sm:$0xff]  ;;  %186 = vmatpush.msra.mxu0 %v69_v0  ;;  %v100_v4 = vld [vmem:[%s1124_s4 + $0x170] sm:$0xff]  ;;  %v99_v8 = vld [vmem:[%s1124_s4 + $0x168] sm:$0xff] }
   0x3   :  { %232 = vmatpush.msra.mxu2 %v101_v1  ;;  %v85_v3 = vld [vmem:[%s1124_s4 + $0xf8] sm:$0xff]  ;;  %v84_v7 = vld [vmem:[%s1124_s4 + $0xf0] sm:$0xff]  ;;  %v83_v10 = vld [vmem:[%s1124_s4 + $0xe8] sm:$0xff] }
   0x4   :  { %v117_v5 = vld [vmem:[%s1124_s4 + $0x1f8] sm:$0xff]  ;;  %209 = vmatpush.msra.mxu1 %v85_v3  ;;  %187 = vmatpush.msra.mxu0 %v68_v2  ;;  %v116_v9 = vld [vmem:[%s1124_s4 + $0x1f0] sm:$0xff]  ;;  %v66_v11 = vld [vmem:[%s1124_s4 + $0x60] sm:$0xff] }
   0x5   :  { %255 = vmatpush.msra.mxu3 %v117_v5  ;;  %233 = vmatpush.msra.mxu2 %v100_v4  ;;  %v98_v12 = vld [vmem:[%s1124_s4 + $0x160] sm:$0xff]  ;;  %v115_v13 = vld [vmem:[%s1124_s4 + $0x1e8] sm:$0xff]  ;;  %v65_v16 = vld [vmem:[%s1124_s4 + $0x58] sm:$0xff] }
   0x6   :  { %210 = vmatpush.msra.mxu1 %v84_v7  ;;  %188 = vmatpush.msra.mxu0 %v67_v6  ;;  %v82_v14 = vld [vmem:[%s1124_s4 + $0xe0] sm:$0xff]  ;;  %v97_v17 = vld [vmem:[%s1124_s4 + $0x158] sm:$0xff]  ;;  %v64_v20 = vld [vmem:[%s1124_s4 + $0x50] sm:$0xff] }
   0x7   :  { %256 = vmatpush.msra.mxu3 %v116_v9  ;;  %234 = vmatpush.msra.mxu2 %v99_v8  ;;  %v114_v15 = vld [vmem:[%s1124_s4 + $0x1e0] sm:$0xff]  ;;  %v81_v18 = vld [vmem:[%s1124_s4 + $0xd8] sm:$0xff]  ;;  %v96_v21 = vld [vmem:[%s1124_s4 + $0x150] sm:$0xff] }
   0x8   :  { %211 = vmatpush.msra.mxu1 %v83_v10  ;;  %189 = vmatpush.msra.mxu0 %v66_v11  ;;  %v113_v19 = vld [vmem:[%s1124_s4 + $0x1d8] sm:$0xff]  ;;  %v80_v22 = vld [vmem:[%s1124_s4 + $0xd0] sm:$0xff]  ;;  %v63_v24 = vld [vmem:[%s1124_s4 + $0x48] sm:$0xff] }
   0x9   :  { %257 = vmatpush.msra.mxu3 %v115_v13  ;;  %235 = vmatpush.msra.mxu2 %v98_v12  ;;  %v112_v23 = vld [vmem:[%s1124_s4 + $0x1d0] sm:$0xff]  ;;  %v95_v25 = vld [vmem:[%s1124_s4 + $0x148] sm:$0xff]  ;;  %v62_v28 = vld [vmem:[%s1124_s4 + $0x40] sm:$0xff] }
   0xa   :  { %212 = vmatpush.msra.mxu1 %v82_v14  ;;  %190 = vmatpush.msra.mxu0 %v65_v16  ;;  %v79_v26 = vld [vmem:[%s1124_s4 + $0xc8] sm:$0xff]  ;;  %v94_v29 = vld [vmem:[%s1124_s4 + $0x140] sm:$0xff]  ;;  %v61_v32 = vld [vmem:[%s1124_s4 + $0x38] sm:$0xff] }
   0xb   :  { %258 = vmatpush.msra.mxu3 %v114_v15  ;;  %236 = vmatpush.msra.mxu2 %v97_v17  ;;  %v111_v27 = vld [vmem:[%s1124_s4 + $0x1c8] sm:$0xff]  ;;  %v78_v30 = vld [vmem:[%s1124_s4 + $0xc0] sm:$0xff]  ;;  %v93_v33 = vld [vmem:[%s1124_s4 + $0x138] sm:$0xff] }
   0xc   :  { %213 = vmatpush.msra.mxu1 %v81_v18  ;;  %191 = vmatpush.msra.mxu0 %v64_v20  ;;  %v110_v31 = vld [vmem:[%s1124_s4 + $0x1c0] sm:$0xff]  ;;  %v77_v34 = vld [vmem:[%s1124_s4 + $0xb8] sm:$0xff]  ;;  %v60_v36 = vld [vmem:[%s1124_s4 + $0x30] sm:$0xff] }
   0xd   :  { %259 = vmatpush.msra.mxu3 %v113_v19  ;;  %237 = vmatpush.msra.mxu2 %v96_v21  ;;  %v109_v35 = vld [vmem:[%s1124_s4 + $0x1b8] sm:$0xff]  ;;  %v92_v37 = vld [vmem:[%s1124_s4 + $0x130] sm:$0xff]  ;;  %v59_v40 = vld [vmem:[%s1124_s4 + $0x28] sm:$0xff] }
   0xe   :  { %214 = vmatpush.msra.mxu1 %v80_v22  ;;  %192 = vmatpush.msra.mxu0 %v63_v24  ;;  %v76_v38 = vld [vmem:[%s1124_s4 + $0xb0] sm:$0xff]  ;;  %v91_v41 = vld [vmem:[%s1124_s4 + $0x128] sm:$0xff]  ;;  %v58_v44 = vld [vmem:[%s1124_s4 + $0x20] sm:$0xff] }
   0xf   :  { %260 = vmatpush.msra.mxu3 %v112_v23  ;;  %238 = vmatpush.msra.mxu2 %v95_v25  ;;  %v108_v39 = vld [vmem:[%s1124_s4 + $0x1b0] sm:$0xff]  ;;  %v75_v42 = vld [vmem:[%s1124_s4 + $0xa8] sm:$0xff]  ;;  %v90_v45 = vld [vmem:[%s1124_s4 + $0x120] sm:$0xff] }
  0x10   :  { %215 = vmatpush.msra.mxu1 %v79_v26  ;;  %193 = vmatpush.msra.mxu0 %v62_v28  ;;  %v107_v43 = vld [vmem:[%s1124_s4 + $0x1a8] sm:$0xff]  ;;  %v74_v46 = vld [vmem:[%s1124_s4 + $0xa0] sm:$0xff]  ;;  %v57_v48 = vld [vmem:[%s1124_s4 + $0x18] sm:$0xff] }
  0x11   :  { %261 = vmatpush.msra.mxu3 %v111_v27  ;;  %239 = vmatpush.msra.mxu2 %v94_v29  ;;  %v106_v47 = vld [vmem:[%s1124_s4 + $0x1a0] sm:$0xff]  ;;  %v89_v49 = vld [vmem:[%s1124_s4 + $0x118] sm:$0xff]  ;;  %v56_v52 = vld [vmem:[%s1124_s4 + $0x10] sm:$0xff] }
  0x12   :  { %216 = vmatpush.msra.mxu1 %v78_v30  ;;  %194 = vmatpush.msra.mxu0 %v61_v32  ;;  %v73_v50 = vld [vmem:[%s1124_s4 + $0x98] sm:$0xff]  ;;  %v88_v53 = vld [vmem:[%s1124_s4 + $0x110] sm:$0xff]  ;;  %v55_v56 = vld [vmem:[%s1124_s4 + $0x8] sm:$0xff] }
  0x13   :  { %262 = vmatpush.msra.mxu3 %v110_v31  ;;  %240 = vmatpush.msra.mxu2 %v93_v33  ;;  %v105_v51 = vld [vmem:[%s1124_s4 + $0x198] sm:$0xff]  ;;  %v72_v54 = vld [vmem:[%s1124_s4 + $0x90] sm:$0xff]  ;;  %v87_v57 = vld [vmem:[%s1124_s4 + $0x108] sm:$0xff] }
  0x14   :  { %217 = vmatpush.msra.mxu1 %v77_v34  ;;  %195 = vmatpush.msra.mxu0 %v60_v36  ;;  %v104_v55 = vld [vmem:[%s1124_s4 + $0x190] sm:$0xff]  ;;  %v71_v58 = vld [vmem:[%s1124_s4 + $0x88] sm:$0xff]  ;;  %v54_v60 = vld [vmem:[%s1124_s4] sm:$0xff] }
  0x15   :  { %263 = vmatpush.msra.mxu3 %v109_v35  ;;  %241 = vmatpush.msra.mxu2 %v92_v37  ;;  %v103_v59 = vld [vmem:[%s1124_s4 + $0x188] sm:$0xff]  ;;  %v86_v61 = vld [vmem:[%s1124_s4 + $0x100] sm:$0xff]  ;;  %v133_v62 = vld [vmem:[%s1124_s4 + $0x278] sm:$0xff] }
  0x16   :  { %218 = vmatpush.msra.mxu1 %v76_v38  ;;  %196 = vmatpush.msra.mxu0 %v59_v40  ;;  %v165_v63 = vld [vmem:[%s1124_s4 + $0x378] sm:$0xff]  ;;  %v70_v0 = vld [vmem:[%s1124_s4 + $0x80] sm:$0xff]  ;;  %v132_v2 = vld [vmem:[%s1124_s4 + $0x270] sm:$0xff] }
  0x17   :  { %264 = vmatpush.msra.mxu3 %v108_v39  ;;  %242 = vmatpush.msra.mxu2 %v91_v41  ;;  %v102_v1 = vld [vmem:[%s1124_s4 + $0x180] sm:$0xff]  ;;  %v149_v3 = vld [vmem:[%s1124_s4 + $0x2f8] sm:$0xff]  ;;  %v164_v4 = vld [vmem:[%s1124_s4 + $0x370] sm:$0xff] }
  0x18   :  { %219 = vmatpush.msra.mxu1 %v75_v42  ;;  %197 = vmatpush.msra.mxu0 %v58_v44  ;;  %v181_v5 = vld [vmem:[%s1124_s4 + $0x3f8] sm:$0xff]  ;;  %v131_v6 = vld [vmem:[%s1124_s4 + $0x268] sm:$0xff]  ;;  %v148_v7 = vld [vmem:[%s1124_s4 + $0x2f0] sm:$0xff] }
  0x19   :  { %265 = vmatpush.msra.mxu3 %v107_v43  ;;  %243 = vmatpush.msra.mxu2 %v90_v45  ;;  %v163_v8 = vld [vmem:[%s1124_s4 + $0x368] sm:$0xff]  ;;  %v180_v9 = vld [vmem:[%s1124_s4 + $0x3f0] sm:$0xff]  ;;  %v130_v10 = vld [vmem:[%s1124_s4 + $0x260] sm:$0xff] }
  0x1a   :  { %220 = vmatpush.msra.mxu1 %v74_v46  ;;  %198 = vmatpush.msra.mxu0 %v57_v48  ;;  %v147_v11 = vld [vmem:[%s1124_s4 + $0x2e8] sm:$0xff]  ;;  %v162_v12 = vld [vmem:[%s1124_s4 + $0x360] sm:$0xff]  ;;  %v129_v14 = vld [vmem:[%s1124_s4 + $0x258] sm:$0xff] }
  0x1b   :  { %266 = vmatpush.msra.mxu3 %v106_v47  ;;  %244 = vmatpush.msra.mxu2 %v89_v49  ;;  %v179_v13 = vld [vmem:[%s1124_s4 + $0x3e8] sm:$0xff]  ;;  %v146_v15 = vld [vmem:[%s1124_s4 + $0x2e0] sm:$0xff]  ;;  %v161_v16 = vld [vmem:[%s1124_s4 + $0x358] sm:$0xff] }
  0x1c   :  { %221 = vmatpush.msra.mxu1 %v73_v50  ;;  %199 = vmatpush.msra.mxu0 %v56_v52  ;;  %v178_v17 = vld [vmem:[%s1124_s4 + $0x3e0] sm:$0xff]  ;;  %v128_v18 = vld [vmem:[%s1124_s4 + $0x250] sm:$0xff]  ;;  %v145_v19 = vld [vmem:[%s1124_s4 + $0x2d8] sm:$0xff] }
  0x1d   :  { %267 = vmatpush.msra.mxu3 %v105_v51  ;;  %245 = vmatpush.msra.mxu2 %v88_v53  ;;  %v160_v20 = vld [vmem:[%s1124_s4 + $0x350] sm:$0xff]  ;;  %v177_v21 = vld [vmem:[%s1124_s4 + $0x3d8] sm:$0xff]  ;;  %v127_v22 = vld [vmem:[%s1124_s4 + $0x248] sm:$0xff] }
  0x1e   :  { %222 = vmatpush.msra.mxu1 %v72_v54  ;;  %200 = vmatpush.msra.mxu0 %v55_v56  ;;  %v144_v23 = vld [vmem:[%s1124_s4 + $0x2d0] sm:$0xff]  ;;  %v159_v24 = vld [vmem:[%s1124_s4 + $0x348] sm:$0xff]  ;;  %v126_v26 = vld [vmem:[%s1124_s4 + $0x240] sm:$0xff] }
  0x1f   :  { %268 = vmatpush.msra.mxu3 %v104_v55  ;;  %246 = vmatpush.msra.mxu2 %v87_v57  ;;  %v176_v25 = vld [vmem:[%s1124_s4 + $0x3d0] sm:$0xff]  ;;  %v143_v27 = vld [vmem:[%s1124_s4 + $0x2c8] sm:$0xff]  ;;  %v158_v28 = vld [vmem:[%s1124_s4 + $0x340] sm:$0xff] }
  0x20   :  { %223 = vmatpush.msra.mxu1 %v71_v58  ;;  %201 = vmatpush.msra.mxu0 %v54_v60  ;;  %v175_v29 = vld [vmem:[%s1124_s4 + $0x3c8] sm:$0xff]  ;;  %v38_v30 = vld [vmem:[%s1125_s0] sm:$0xff]  ;;  %v40_v31 = vld [vmem:[%s1125_s0 + $0x10] sm:$0xff] }
  0x21   :  { %269 = vmatpush.msra.mxu3 %v103_v59  ;;  %247 = vmatpush.msra.mxu2 %v86_v61  ;;  %v125_v32 = vld [vmem:[%s1124_s4 + $0x238] sm:$0xff]  ;;  %v142_v33 = vld [vmem:[%s1124_s4 + $0x2c0] sm:$0xff]  ;;  %v39_v36 = vld [vmem:[%s1125_s0 + $0x8] sm:$0xff] }
  0x22   :  { %278 = vmatpush.msrb.mxu0 %v133_v62  ;;  %224 = vmatpush.msra.mxu1 %v70_v0  ;;  %v157_v34 = vld [vmem:[%s1124_s4 + $0x338] sm:$0xff]  ;;  %v174_v35 = vld [vmem:[%s1124_s4 + $0x3c0] sm:$0xff]  ;;  %v124_v38 = vld [vmem:[%s1124_s4 + $0x230] sm:$0xff] }
  0x23   :  { %324 = vmatpush.msrb.mxu2 %v165_v63  ;;  %270 = vmatpush.msra.mxu3 %v102_v1  ;;  %v41_v37 = vld [vmem:[%s1125_s0 + $0x18] sm:$0xff]  ;;  %v156_v40 = vld [vmem:[%s1124_s4 + $0x330] sm:$0xff]  ;;  %v123_v42 = vld [vmem:[%s1124_s4 + $0x228] sm:$0xff] }
  0x24   :  { %279 = vmatpush.msrb.mxu0 %v132_v2  ;;  %301 = vmatpush.msrb.mxu1 %v149_v3  ;;  %v141_v39 = vld [vmem:[%s1124_s4 + $0x2b8] sm:$0xff]  ;;  %v140_v43 = vld [vmem:[%s1124_s4 + $0x2b0] sm:$0xff]  ;;  %v155_v44 = vld [vmem:[%s1124_s4 + $0x328] sm:$0xff] }
  0x25   :  { %325 = vmatpush.msrb.mxu2 %v164_v4  ;;  %347 = vmatpush.msrb.mxu3 %v181_v5  ;;  %v173_v41 = vld [vmem:[%s1124_s4 + $0x3b8] sm:$0xff]  ;;  %v172_v45 = vld [vmem:[%s1124_s4 + $0x3b0] sm:$0xff]  ;;  %v122_v46 = vld [vmem:[%s1124_s4 + $0x220] sm:$0xff] }
  0x26   :  { %280 = vmatpush.msrb.mxu0 %v131_v6  ;;  %302 = vmatpush.msrb.mxu1 %v148_v7  ;;  %v139_v47 = vld [vmem:[%s1124_s4 + $0x2a8] sm:$0xff]  ;;  %v154_v48 = vld [vmem:[%s1124_s4 + $0x320] sm:$0xff]  ;;  %v48_v51 = vld [vmem:[%s1125_s0 + $0x50] sm:$0xf] }
  0x27   :  { %326 = vmatpush.msrb.mxu2 %v163_v8  ;;  %348 = vmatpush.msrb.mxu3 %v180_v9  ;;  %v171_v49 = vld [vmem:[%s1124_s4 + $0x3a8] sm:$0xff]  ;;  %v46_v50 = vld [vmem:[%s1125_s0 + $0x40] sm:$0xf]  ;;  %v121_v52 = vld [vmem:[%s1124_s4 + $0x218] sm:$0xff] }
  0x28   :  { %281 = vmatpush.msrb.mxu0 %v130_v10  ;;  %303 = vmatpush.msrb.mxu1 %v147_v11  ;;  %v138_v53 = vld [vmem:[%s1124_s4 + $0x2a0] sm:$0xff]  ;;  %v153_v54 = vld [vmem:[%s1124_s4 + $0x318] sm:$0xff]  ;;  %v47_v56 = vld [vmem:[%s1125_s0 + $0x48] sm:$0xf] }
  0x29   :  { %327 = vmatpush.msrb.mxu2 %v162_v12  ;;  %349 = vmatpush.msrb.mxu3 %v179_v13  ;;  %v170_v55 = vld [vmem:[%s1124_s4 + $0x3a0] sm:$0xff]  ;;  %v49_v57 = vld [vmem:[%s1125_s0 + $0x58] sm:$0xf]  ;;  %v120_v58 = vld [vmem:[%s1124_s4 + $0x210] sm:$0xff] }
  0x2a   :  { %282 = vmatpush.msrb.mxu0 %v129_v14  ;;  %304 = vmatpush.msrb.mxu1 %v146_v15  ;;  %v137_v59 = vld [vmem:[%s1124_s4 + $0x298] sm:$0xff]  ;;  %v152_v60 = vld [vmem:[%s1124_s4 + $0x310] sm:$0xff]  ;;  %v119_v62 = vld [vmem:[%s1124_s4 + $0x208] sm:$0xff] }
  0x2b   :  { %328 = vmatpush.msrb.mxu2 %v161_v16  ;;  %350 = vmatpush.msrb.mxu3 %v178_v17  ;;  %v169_v61 = vld [vmem:[%s1124_s4 + $0x398] sm:$0xff]  ;;  %v136_v63 = vld [vmem:[%s1124_s4 + $0x290] sm:$0xff]  ;;  %v151_v0 = vld [vmem:[%s1124_s4 + $0x308] sm:$0xff] }
  0x2c   :  { %283 = vmatpush.msrb.mxu0 %v128_v18  ;;  %305 = vmatpush.msrb.mxu1 %v145_v19  ;;  %v168_v1 = vld [vmem:[%s1124_s4 + $0x390] sm:$0xff]  ;;  %v118_v2 = vld [vmem:[%s1124_s4 + $0x200] sm:$0xff]  ;;  %v135_v3 = vld [vmem:[%s1124_s4 + $0x288] sm:$0xff] }
  0x2d   :  { %329 = vmatpush.msrb.mxu2 %v160_v20  ;;  %351 = vmatpush.msrb.mxu3 %v177_v21  ;;  %v150_v4 = vld [vmem:[%s1124_s4 + $0x300] sm:$0xff]  ;;  %v167_v5 = vld [vmem:[%s1124_s4 + $0x388] sm:$0xff]  ;;  %v44_v7 = vld [vmem:[%s1125_s0 + $0x30] sm:$0xff] }
  0x2e   :  { %284 = vmatpush.msrb.mxu0 %v127_v22  ;;  %306 = vmatpush.msrb.mxu1 %v144_v23  ;;  %v42_v6 = vld [vmem:[%s1125_s0 + $0x20] sm:$0xff]  ;;  %v43_v10 = vld [vmem:[%s1125_s0 + $0x28] sm:$0xff]  ;;  %v45_v11 = vld [vmem:[%s1125_s0 + $0x38] sm:$0xff] }
  0x2f   :  { %330 = vmatpush.msrb.mxu2 %v159_v24  ;;  %352 = vmatpush.msrb.mxu3 %v176_v25  ;;  %v134_v8 = vld [vmem:[%s1124_s4 + $0x280] sm:$0xff]  ;;  %v52_v13 = vld [vmem:[%s1125_s0 + $0x70] sm:$0xf]  ;;  %v51_v14 = vld [vmem:[%s1125_s0 + $0x68] sm:$0xf] }
  0x30   :  { %285 = vmatpush.msrb.mxu0 %v126_v26  ;;  %307 = vmatpush.msrb.mxu1 %v143_v27  ;;  %v166_v9 = vld [vmem:[%s1124_s4 + $0x380] sm:$0xff]  ;;  %v53_v15 = vld [vmem:[%s1125_s0 + $0x78] sm:$0xf]  ;;  %v384_v17 = vld [vmem:[%s1128_s7 + $0x48] sm:$0xff] }
  0x31   :  { %331 = vmatpush.msrb.mxu2 %v158_v28  ;;  %353 = vmatpush.msrb.mxu3 %v175_v29  ;;  %v50_v12 = vld [vmem:[%s1125_s0 + $0x60] sm:$0xf]  ;;  %v491_v18 = vld [vmem:[%s1129_s9 + $0x8] sm:$0xf]  ;;  %v382_v21 = vld [vmem:[%s1128_s7 + $0x38] sm:$0xff] }
  0x32   :  { %202 = vmatmul.f32.vlgmr.msra.gmra.mxu0 %v38_v30  ;;  %248 = vmatmul.f32.vlgmr.msra.gmra.mxu2 %v40_v31  ;;  %v451_v16 = vld [vmem:[%s1127_s8] sm:$0xf]  ;;  %v381_v22 = vld [vmem:[%s1128_s7 + $0x30] sm:$0xff]  ;;  %v380_v23 = vld [vmem:[%s1128_s7 + $0x28] sm:$0xff] }
  0x33   :  { %286 = vmatpush.msrb.mxu0 %v125_v32  ;;  %308 = vmatpush.msrb.mxu1 %v142_v33  ;;  %v383_v19 = vld [vmem:[%s1128_s7 + $0x40] sm:$0xff]  ;;  %v378_v26 = vld [vmem:[%s1128_s7 + $0x18] sm:$0xff]  ;;  %v377_v27 = vld [vmem:[%s1128_s7 + $0x10] sm:$0xff] }
  0x34   :  { %332 = vmatpush.msrb.mxu2 %v157_v34  ;;  %354 = vmatpush.msrb.mxu3 %v174_v35  ;;  %v372_v20 = vld [vmem:[%s1130_s6] sm:$0x3]  ;;  %v376_v29 = vld [vmem:[%s1128_s7 + $0x8] sm:$0xff] }
  0x35   :  { %225 = vmatmul.f32.vlgmr.msra.gmra.mxu1 %v39_v36  ;;  %271 = vmatmul.f32.vlgmr.msra.gmra.mxu3 %v41_v37  ;;  %v490_v24 = vld [vmem:[%s1129_s9] sm:$0xff]  ;;  %v450_v36 = vld [vmem:[%s1131_s2 + $0x8] sm:$0xf] }
  0x36   :  { %287 = vmatpush.msrb.mxu0 %v124_v38  ;;  %309 = vmatpush.msrb.mxu1 %v141_v39  ;;  %v379_v25 = vld [vmem:[%s1128_s7 + $0x20] sm:$0xff]  ;;  %v489_v38 = vld [vmem:[%s1132_s3 + $0x8] sm:$0xf] }
  0x37   :  { %333 = vmatpush.msrb.mxu2 %v156_v40  ;;  %355 = vmatpush.msrb.mxu3 %v173_v41  ;;  %v449_v28 = vld [vmem:[%s1131_s2] sm:$0xff]  ;;  %v374_v40 = vld [vmem:[%s1133_s1 + $0x8] sm:$0xf] }
  0x38   :  { %288 = vmatpush.msrb.mxu0 %v123_v42  ;;  %310 = vmatpush.msrb.mxu1 %v140_v43  ;;  %v488_v30 = vld [vmem:[%s1132_s3] sm:$0xff] }
  0x39   :  { %334 = vmatpush.msrb.mxu2 %v155_v44  ;;  %356 = vmatpush.msrb.mxu3 %v172_v45  ;;  %v375_v31 = vld [vmem:[%s1128_s7] sm:$0xff] }
  0x3a   :  { %289 = vmatpush.msrb.mxu0 %v122_v46  ;;  %311 = vmatpush.msrb.mxu1 %v139_v47  ;;  %v373_v32 = vld [vmem:[%s1133_s1] sm:$0xff] }
  0x3b   :  { %335 = vmatpush.msrb.mxu2 %v154_v48  ;;  %357 = vmatpush.msrb.mxu3 %v171_v49  ;;  %v553_v34 = vld [vmem:[%s1126_s5] ss:$0 sm:$0xff] }
  0x3c   :  { %205 = vmatmul.f32.gmra.mxu0 %v46_v50  ;;  %251 = vmatmul.f32.gmra.mxu2 %v48_v51 }
  0x3d   :  { %290 = vmatpush.msrb.mxu0 %v121_v52  ;;  %312 = vmatpush.msrb.mxu1 %v138_v53 }
  0x3e   :  { %336 = vmatpush.msrb.mxu2 %v153_v54  ;;  %358 = vmatpush.msrb.mxu3 %v170_v55 }
  0x3f   :  { %228 = vmatmul.f32.gmra.mxu1 %v47_v56  ;;  %274 = vmatmul.f32.gmra.mxu3 %v49_v57 }
  0x40   :  { %291 = vmatpush.msrb.mxu0 %v120_v58  ;;  %313 = vmatpush.msrb.mxu1 %v137_v59 }
  0x41   :  { %337 = vmatpush.msrb.mxu2 %v152_v60  ;;  %359 = vmatpush.msrb.mxu3 %v169_v61 }
  0x42   :  { %292 = vmatpush.msrb.mxu0 %v119_v62  ;;  %314 = vmatpush.msrb.mxu1 %v136_v63 }
  0x43   :  { %338 = vmatpush.msrb.mxu2 %v151_v0  ;;  %360 = vmatpush.msrb.mxu3 %v168_v1 }
  0x44   :  { %293 = vmatpush.msrb.mxu0 %v118_v2  ;;  %315 = vmatpush.msrb.mxu1 %v135_v3 }
  0x45   :  { %339 = vmatpush.msrb.mxu2 %v150_v4  ;;  %361 = vmatpush.msrb.mxu3 %v167_v5 }
  0x46   :  { %294 = vmatmul.f32.vlgmr.msrb.gmra.mxu0 %v42_v6  ;;  %340 = vmatmul.f32.vlgmr.msrb.gmra.mxu2 %v44_v7 }
  0x47   :  { %316 = vmatpush.msrb.mxu1 %v134_v8  ;;  %362 = vmatpush.msrb.mxu3 %v166_v9 }
  0x48   :  { %317 = vmatmul.f32.vlgmr.msrb.gmra.mxu1 %v43_v10  ;;  %363 = vmatmul.f32.vlgmr.msrb.gmra.mxu3 %v45_v11 }
  0x49   :  { %547 = vmatpush.msk.msra.mxu2 %vm459_vm0, %v451_v16  ;;  %398 = vmatpush.msra.mxu0 %v384_v17 }
  0x4a   :  { %550 = vmatpush.msk.msra.mxu3 %vm459_vm0, %v491_v18  ;;  %544 = vmatpush.msk.msra.mxu1 %vm422_vm1, %v372_v20 }
  0x4b   :  { %399 = vmatpush.msra.mxu0 %v383_v19 }
  0x4c   :  { %517 = vmatpush.msra.mxu3 %v490_v24 }
  0x4d   :  { %400 = vmatpush.msra.mxu0 %v382_v21 }
  0x4e   :  { %297 = vmatmul.f32.gmra.mxu0 %v50_v12  ;;  %343 = vmatmul.f32.gmra.mxu2 %v52_v13  ;;  %v554_v13 = vld [vmem:[%s1134_s10] ss:$0 sm:$0xff] }
  0x4f   :  { %401 = vmatpush.msra.mxu0 %v381_v22 }
  0x50   :  { %320 = vmatmul.f32.gmra.mxu1 %v51_v14  ;;  %366 = vmatmul.f32.gmra.mxu3 %v53_v15 }
  0x51   :  { %402 = vmatpush.msra.mxu0 %v380_v23 }
  0x53   :  { %403 = vmatpush.msra.mxu0 %v379_v25 }
  0x55   :  { %404 = vmatpush.msra.mxu0 %v378_v26 }
  0x56   :  { %548 = vmatmul.msk.f32.vlgmr.msra.gmra.mxu2 %vm452_vm2, %v449_v28 }
  0x57   :  { %405 = vmatpush.msra.mxu0 %v377_v27 }
  0x58   :  { %551 = vmatmul.msk.f32.vlgmr.msra.gmra.mxu3 %vm492_vm3, %v488_v30 }
  0x59   :  { %406 = vmatpush.msra.mxu0 %v376_v29 }
  0x5b   :  { %407 = vmatpush.msra.mxu0 %v375_v31 }
  0x5c   :  { %542 = vmatmul.msk.f32.vlgmr.msra.gmra.mxu0 %vm385_vm4, %v373_v32 }
  0x5e   :  { %549 = vmatmul.msk.f32.gmra.mxu2 %vm452_vm2, %v450_v36 }
  0x60   :  { %552 = vmatmul.msk.f32.gmra.mxu3 %vm492_vm3, %v489_v38 }
  0x64   :  { %543 = vmatmul.msk.f32.gmra.mxu0 %vm385_vm4, %v374_v40 }
  0xaf   :  { %v203_v33 = vpop.f32.mrf.mxu0 }
  0xb0   :  { %v204_v39 = vadd.f32 %v553_v34, %v203_v33 }
  0xb2   :  { %v226_v35 = vpop.f32.mrf.mxu1 }
  0xb3   :  { %v227_v43 = vadd.f32 %v226_v35, %v204_v39 }
  0xb5   :  { %v249_v37 = vpop.f32.mrf.mxu2 }
  0xb6   :  { %v250_v45 = vadd.f32 %v249_v37, %v227_v43 }
  0xb8   :  { %v272_v41 = vpop.f32.mrf.mxu3 }
  0xb9   :  { %v206_v42 = vpop.f32.mrf.mxu0  ;;  %v273_v48 = vadd.f32 %v272_v41, %v250_v45 }
  0xba   :  { %v207_v46 = vadd.f32 %v553_v34, %v206_v42 }
  0xbc   :  { %v229_v44 = vpop.f32.mrf.mxu1 }
  0xbd   :  { %v230_v49 = vadd.f32 %v229_v44, %v207_v46 }
  0xbf   :  { %v252_v47 = vpop.f32.mrf.mxu2 }
  0xc0   :  { %v253_v54 = vadd.f32 %v252_v47, %v230_v49 }
  0xc2   :  { %v275_v50 = vpop.f32.mrf.mxu3 }
  0xc3   :  { %v295_v51 = vpop.f32.mrf.mxu0  ;;  %v276_v57 = vadd.f32 %v275_v50, %v253_v54 }
  0xc4   :  { %v296_v52 = vadd.f32 %v295_v51, %v273_v48 }
  0xc5   :  { %v318_v53 = vpop.f32.mrf.mxu1 }
  0xc6   :  { %v319_v55 = vadd.f32 %v318_v53, %v296_v52 }
  0xc9   :  { %v341_v56 = vpop.f32.mrf.mxu2 }
  0xca   :  { %v342_v58 = vadd.f32 %v341_v56, %v319_v55 }
  0xcb   :  { %v298_v59 = vpop.f32.mrf.mxu0  ;;  %v364_v60 = vpop.f32.mrf.mxu3 }
  0xcc   :  { %v299_v61 = vadd.f32 %v298_v59, %v276_v57  ;;  %v365_v62 = vadd.f32 %v364_v60, %v342_v58 }
  0xcd   :  { %v321_v63 = vpop.f32.mrf.mxu1 }
  0xce   :  { %v370_v0 = vmax.f32 %v365_v62, 0.0  ;;  %v322_v1 = vadd.f32 %v321_v63, %v299_v61 }
  0xd0   :  { %545 = vmatmul.msk.f32.vlgmr.msra.gmra.mxu1 %vm415_vm5, %v370_v0 }
  0xd1   :  { %v344_v2 = vpop.f32.mrf.mxu2 }
  0xd2   :  { %v345_v3 = vadd.f32 %v344_v2, %v322_v1 }
  0xd3   :  { %v367_v4 = vpop.f32.mrf.mxu3 }
  0xd4   :  { %v368_v5 = vadd.f32 %v367_v4, %v345_v3 }
  0xd6   :  { %v371_v6 = vmax.f32 %v368_v5, 0.0 }
  0xd8   :  { %546 = vmatmul.msk.f32.gmra.mxu1 %vm415_vm5, %v371_v6 }
  0xd9   :  { %v409_v7 = vpop.f32.mrf.mxu0  ;;  %v480_v8 = vpop.f32.mrf.mxu2 }
  0xdb   :  { %v519_v10 = vpop.f32.mrf.mxu3 }
  0xe1   :  { %v412_v15 = vpop.f32.mrf.mxu0  ;;  %v483_v18 = vpop.f32.mrf.mxu2 }
  0xe3   :  { %v522_v21 = vpop.f32.mrf.mxu3 }
 0x14d   :  { %v443_v9 = vpop.f32.mrf.mxu1 }
 0x14e   :  { %v444_v11 = vadd.f32 %v443_v9, %v409_v7 }
 0x150   :  { %v486_v12 = vadd.f32 %v480_v8, %v444_v11 }
 0x152   :  { %v525_v14 = vadd.f32 %v519_v10, %v486_v12 }
 0x154   :  { %v531_v16 = vadd.f32 %v554_v13, %v525_v14 }
 0x155   :  { %v446_v17 = vpop.f32.mrf.mxu1 }
 0x156   :  { %v533_v19 = vmax.f32 %v531_v16, 0.0  ;;  %v447_v20 = vadd.f32 %v446_v17, %v412_v15 }
 0x158   :  { %535 = vst.msk [vmem:[%s1135_s11] sm:$0xff] %vm415_vm5, %v533_v19  ;;  %v487_v22 = vadd.f32 %v483_v18, %v447_v20 }
 0x15a   :  { %v526_v23 = vadd.f32 %v522_v21, %v487_v22 }
 0x15c   :  { %v532_v24 = vadd.f32 %v554_v13, %v526_v23 }
 0x15e   :  { %v534_v25 = vmax.f32 %v532_v24, 0.0 }
 0x160   :  { %537 = vst.msk [vmem:[%s1135_s11 + $0x8] sm:$0xf] %vm536_vm6, %v534_v25 }

</bundles_post_ra>
